<compile_context>
chip_gen: v5e
topology: v5e:2x2
jax: 0.10.0
libtpu: 0.0.40
codegen_flags: <defaults>
</compile_context>

<pallas_src>
import functools

import jax
import jax.numpy as jnp
from jax.experimental import pallas as pl
from jax.experimental.pallas import tpu as pltpu

_SUBLANE = 8
_LANE = 128
_VMEM_LIMIT = 32 * 1024 * 1024


# ----------------------------------------------------------------------------
# Small helpers
# ----------------------------------------------------------------------------
def _round_up(x, m):
    return ((x + m - 1) // m) * m


def _pad_to(a, rows, cols):
    pr, pc = rows - a.shape[0], cols - a.shape[1]
    if pr == 0 and pc == 0:
        return a
    return jnp.pad(a, ((0, pr), (0, pc)))


def _pick_tile(dim, candidates):
    """Largest candidate tile that evenly divides `dim` (dim is pre-padded)."""
    for t in candidates:
        if dim % t == 0:
            return t
    return dim


def _tiles(Bp, Kp, Np):
    tm = _pick_tile(Bp, (256, 128, 64, 32, 16, 8))
    tk = _pick_tile(Kp, (512, 256, 128))
    tn = _pick_tile(Np, (256, 128))
    return tm, tk, tn


# ----------------------------------------------------------------------------
# Pallas kernels
# ----------------------------------------------------------------------------
def _dlgn_hidden_layer_kernel(beta, g_ref, v_ref, wg_ref, wv_ref,
                              g_out_ref, v_out_ref, acc_g_ref, acc_v_ref):
    """Fused hidden layer: g_new = g @ Wg, v_new = (v @ Wv) * sigmoid(beta*g_new)."""
    k = pl.program_id(2)

    @pl.when(k == 0)
    def _():
        acc_g_ref[...] = jnp.zeros_like(acc_g_ref)
        acc_v_ref[...] = jnp.zeros_like(acc_v_ref)

    acc_g_ref[...] += jnp.dot(g_ref[...], wg_ref[...],
                              preferred_element_type=jnp.float32)
    acc_v_ref[...] += jnp.dot(v_ref[...], wv_ref[...],
                              preferred_element_type=jnp.float32)

    @pl.when(k == pl.num_programs(2) - 1)
    def _():
        g_new = acc_g_ref[...]
        gate = jax.nn.sigmoid(beta * g_new)      # f32 gate math (EUP slot)
        g_out_ref[...] = g_new
        v_out_ref[...] = acc_v_ref[...] * gate


def _dlgn_first_pwc_layer_kernel(beta, g_ref, wg_ref, vrow_ref,
                                 g_out_ref, v_out_ref, acc_g_ref):
    """First layer in 'pwc' mode: value path is colsum(Wv) broadcast * gate."""
    k = pl.program_id(2)

    @pl.when(k == 0)
    def _():
        acc_g_ref[...] = jnp.zeros_like(acc_g_ref)

    acc_g_ref[...] += jnp.dot(g_ref[...], wg_ref[...],
                              preferred_element_type=jnp.float32)

    @pl.when(k == pl.num_programs(2) - 1)
    def _():
        g_new = acc_g_ref[...]
        gate = jax.nn.sigmoid(beta * g_new)
        g_out_ref[...] = g_new
        v_out_ref[...] = vrow_ref[...] * gate    # (1, tn) broadcast over batch


def _dlgn_output_layer_kernel(v_ref, wv_ref, out_ref, acc_ref):
    """Final value layer: plain bias-free matmul with K accumulation."""
    k = pl.program_id(2)

    @pl.when(k == 0)
    def _():
        acc_ref[...] = jnp.zeros_like(acc_ref)

    acc_ref[...] += jnp.dot(v_ref[...], wv_ref[...],
                            preferred_element_type=jnp.float32)

    @pl.when(k == pl.num_programs(2) - 1)
    def _():
        out_ref[...] = acc_ref[...]


# ----------------------------------------------------------------------------
# pallas_call wrappers (all operands arrive already padded / pre-transposed)
# ----------------------------------------------------------------------------
_COMPILER_PARAMS = pltpu.CompilerParams(
    dimension_semantics=("parallel", "parallel", "arbitrary"),
    vmem_limit_bytes=_VMEM_LIMIT)


def dlgn_hidden_layer(g_pad, v_pad, wg_p, wv_p, beta):
    Bp, Kp = g_pad.shape
    _, Np = wg_p.shape
    tm, tk, tn = _tiles(Bp, Kp, Np)
    grid = (Bp // tm, Np // tn, Kp // tk)
    kernel = functools.partial(_dlgn_hidden_layer_kernel, float(beta))
    cost = pl.CostEstimate(
        flops=2 * 2 * Bp * Kp * Np,
        transcendentals=Bp * Np,
        bytes_accessed=4 * (2 * Bp * Kp + 2 * Kp * Np + 2 * Bp * Np))
    return pl.pallas_call(
        kernel,
        out_shape=(jax.ShapeDtypeStruct((Bp, Np), jnp.float32),
                   jax.ShapeDtypeStruct((Bp, Np), jnp.float32)),
        grid_spec=pltpu.PrefetchScalarGridSpec(
            num_scalar_prefetch=0,
            grid=grid,
            in_specs=[pl.BlockSpec((tm, tk), lambda i, j, k: (i, k)),
                      pl.BlockSpec((tm, tk), lambda i, j, k: (i, k)),
                      pl.BlockSpec((tk, tn), lambda i, j, k: (k, j)),
                      pl.BlockSpec((tk, tn), lambda i, j, k: (k, j))],
            out_specs=[pl.BlockSpec((tm, tn), lambda i, j, k: (i, j)),
                       pl.BlockSpec((tm, tn), lambda i, j, k: (i, j))],
            scratch_shapes=[pltpu.VMEM((tm, tn), jnp.float32),
                            pltpu.VMEM((tm, tn), jnp.float32)]),
        compiler_params=_COMPILER_PARAMS,
        cost_estimate=cost,
    )(g_pad, v_pad, wg_p, wv_p)


def dlgn_first_pwc_layer(g_pad, wg_p, vrow_p, beta):
    Bp, Kp = g_pad.shape
    _, Np = wg_p.shape
    tm, tk, tn = _tiles(Bp, Kp, Np)
    grid = (Bp // tm, Np // tn, Kp // tk)
    kernel = functools.partial(_dlgn_first_pwc_layer_kernel, float(beta))
    cost = pl.CostEstimate(
        flops=2 * Bp * Kp * Np,
        transcendentals=Bp * Np,
        bytes_accessed=4 * (Bp * Kp + Kp * Np + Np + 2 * Bp * Np))
    return pl.pallas_call(
        kernel,
        out_shape=(jax.ShapeDtypeStruct((Bp, Np), jnp.float32),
                   jax.ShapeDtypeStruct((Bp, Np), jnp.float32)),
        grid_spec=pltpu.PrefetchScalarGridSpec(
            num_scalar_prefetch=0,
            grid=grid,
            in_specs=[pl.BlockSpec((tm, tk), lambda i, j, k: (i, k)),
                      pl.BlockSpec((tk, tn), lambda i, j, k: (k, j)),
                      pl.BlockSpec((1, tn), lambda i, j, k: (0, j))],
            out_specs=[pl.BlockSpec((tm, tn), lambda i, j, k: (i, j)),
                       pl.BlockSpec((tm, tn), lambda i, j, k: (i, j))],
            scratch_shapes=[pltpu.VMEM((tm, tn), jnp.float32)]),
        compiler_params=_COMPILER_PARAMS,
        cost_estimate=cost,
    )(g_pad, wg_p, vrow_p)


def dlgn_output_layer(v_pad, wv_p):
    Bp, Kp = v_pad.shape
    _, Np = wv_p.shape
    tm, tk, tn = _tiles(Bp, Kp, Np)
    grid = (Bp // tm, Np // tn, Kp // tk)
    cost = pl.CostEstimate(
        flops=2 * Bp * Kp * Np,
        transcendentals=0,
        bytes_accessed=4 * (Bp * Kp + Kp * Np + Bp * Np))
    return pl.pallas_call(
        _dlgn_output_layer_kernel,
        out_shape=jax.ShapeDtypeStruct((Bp, Np), jnp.float32),
        grid_spec=pltpu.PrefetchScalarGridSpec(
            num_scalar_prefetch=0,
            grid=grid,
            in_specs=[pl.BlockSpec((tm, tk), lambda i, j, k: (i, k)),
                      pl.BlockSpec((tk, tn), lambda i, j, k: (k, j))],
            out_specs=pl.BlockSpec((tm, tn), lambda i, j, k: (i, j)),
            scratch_shapes=[pltpu.VMEM((tm, tn), jnp.float32)]),
        compiler_params=_COMPILER_PARAMS,
        cost_estimate=cost,
    )(v_pad, wv_p)


# ----------------------------------------------------------------------------
# Parameters (torch-layout init), one-time prep, and forward
# ----------------------------------------------------------------------------
def init_dlgn_fc_params(key, input_dim, output_dim, num_hidden_nodes):
    """Mimics torch nn.Linear default init: U(-1/sqrt(fan_in), 1/sqrt(fan_in))."""
    num_nodes = [input_dim] + list(num_hidden_nodes) + [output_dim]
    L = len(num_hidden_nodes)
    gating_w, value_w = [], []
    keys = jax.random.split(key, 2 * (L + 1))
    for i in range(L + 1):
        fan_in, fan_out = num_nodes[i], num_nodes[i + 1]
        bound = 1.0 / jnp.sqrt(fan_in)
        if i != L:
            gating_w.append(jax.random.uniform(
                keys[2 * i], (fan_out, fan_in), jnp.float32, -bound, bound))
        value_w.append(jax.random.uniform(
            keys[2 * i + 1], (fan_out, fan_in), jnp.float32, -bound, bound))
    return {"gating": gating_w, "value": value_w}


def prepare_dlgn_fc_params(params):
    """One-time: transpose to (in, out), zero-pad to 128 multiples, colsum row."""
    def prep(w):
        out_d, in_d = w.shape
        return _pad_to(w.T, _round_up(in_d, _LANE), _round_up(out_d, _LANE))

    gating_p = [prep(w) for w in params["gating"]]
    value_p = [prep(w) for w in params["value"]]
    dims = [params["value"][0].shape[1]] + [w.shape[0] for w in params["value"]]
    value0_colsum = (value_p[0].sum(axis=0, keepdims=True)
                     if len(gating_p) >= 1 else None)
    return {"gating_p": gating_p, "value_p": value_p,
            "value0_colsum": value0_colsum, "dims": dims}


def dlgn_fc_forward(prepared, x, beta=30.0, mode="pwc"):
    """Same semantics as DLGN_FC.forward: returns (values, gate_scores) lists."""
    wg_list = prepared["gating_p"]
    wv_list = prepared["value_p"]
    dims = prepared["dims"]
    L = len(wg_list)

    B = x.shape[0]
    Bp = _round_up(B, _SUBLANE)
    Kp0 = wv_list[0].shape[0]
    x_p = _pad_to(x, Bp, Kp0)

    gate_scores = [x]
    values = [jnp.ones_like(x)] if mode == "pwc" else [x]

    g_pad = x_p
    v_pad = None if mode == "pwc" else x_p

    for i in range(L):
        n_out = dims[i + 1]
        if i == 0 and mode == "pwc":
            g_pad, v_pad = dlgn_first_pwc_layer(
                g_pad, wg_list[0], prepared["value0_colsum"], beta)
        else:
            g_pad, v_pad = dlgn_hidden_layer(
                g_pad, v_pad, wg_list[i], wv_list[i], beta)
        gate_scores.append(g_pad[:B, :n_out])
        values.append(v_pad[:B, :n_out])

    if v_pad is None:  # 'pwc' with zero hidden layers
        v_pad = _pad_to(jnp.ones_like(x), Bp, Kp0)

    out_pad = dlgn_output_layer(v_pad, wv_list[L])
    values.append(out_pad[:B, :dims[-1]])
    return values, gate_scores


# ----------------------------------------------------------------------------
# Pure-JAX reference for correctness checking
# ----------------------------------------------------------------------------
def dlgn_fc_forward_ref(params, x, beta=30.0, mode="pwc"):
    gating_w = params["gating"]
    value_w = params["value"]
    L = len(gating_w)
    gate_scores = [x]
    values = [jnp.ones_like(x)] if mode == "pwc" else [x]
    for i in range(L):
        gs = gate_scores[-1] @ gating_w[i].T
        gate_scores.append(gs)
        gate = jax.nn.sigmoid(beta * gs)
        values.append((values[-1] @ value_w[i].T) * gate)
    values.append(values[-1] @ value_w[L].T)
    return values, gate_scores


# ----------------------------------------------------------------------------
if __name__ == "__main__":
    key = jax.random.PRNGKey(0)
    pkey, xkey = jax.random.split(key)

    batch = 8
    input_dim = 16
    num_hidden_nodes = [32, 64]
    output_dim = 8
    beta = 30.0

    params = init_dlgn_fc_params(pkey, input_dim, output_dim, num_hidden_nodes)
    prepared = prepare_dlgn_fc_params(params)
    x = jax.random.normal(xkey, (batch, input_dim), jnp.float32)

    for mode in ("pwc", "pwl"):
        values, gate_scores = dlgn_fc_forward(prepared, x, beta=beta, mode=mode)
        jax.block_until_ready(values[-1])

        values_ref, gs_ref = dlgn_fc_forward_ref(params, x, beta=beta, mode=mode)
        assert len(values) == len(values_ref)
        assert len(gate_scores) == len(gs_ref)
        for a, b in zip(values, values_ref):
            assert a.shape == b.shape
            assert jnp.allclose(a, b, atol=1e-4, rtol=1e-4)
        for a, b in zip(gate_scores, gs_ref):
            assert a.shape == b.shape
            assert jnp.allclose(a, b, atol=1e-4, rtol=1e-4)

    print("KERNEL_OK")
</pallas_src>

<mosaic_0001>
module attributes {stable_mosaic.version = 11 : i64} {
  func.func @_dlgn_first_pwc_layer_kernel(%arg0: i32, %arg1: i32, %arg2: i32, %arg3: memref<8x128xf32, #tpu.memory_space<vmem>>, %arg4: memref<128x128xf32, #tpu.memory_space<vmem>>, %arg5: memref<1x128xf32, #tpu.memory_space<vmem>>, %arg6: memref<8x128xf32, #tpu.memory_space<vmem>>, %arg7: memref<8x128xf32, #tpu.memory_space<vmem>>, %arg8: memref<8x128xf32, #tpu.memory_space<vmem>>) attributes {dimension_semantics = [#tpu.dimension_semantics<parallel>, #tpu.dimension_semantics<parallel>, #tpu.dimension_semantics<arbitrary>], iteration_bounds = array<i64: 1, 1, 1>, scalar_prefetch = 0 : i64, scratch_operands = 1 : i64, tpu.core_type = #tpu.core_type<tc>, window_params = [{transform_indices = @transform_0, window_bounds = array<i64: 8, 128>}, {transform_indices = @transform_1, window_bounds = array<i64: 128, 128>}, {transform_indices = @transform_2, window_bounds = array<i64: 1, 128>}, {transform_indices = @transform_3, window_bounds = array<i64: 8, 128>}, {transform_indices = @transform_4, window_bounds = array<i64: 8, 128>}]} {
    %c0_i32 = arith.constant 0 : i32
    %0 = arith.cmpi eq, %arg2, %c0_i32 : i32
    %1 = arith.extui %0 : i1 to i32
    %c0_i32_0 = arith.constant 0 : i32
    %2 = arith.cmpi ne, %1, %c0_i32_0 : i32
    scf.if %2 {
      %cst_10 = arith.constant 0.000000e+00 : f32
      %12 = vector.broadcast %cst_10 : f32 to vector<8x128xf32>
      %c0_11 = arith.constant 0 : index
      %c0_12 = arith.constant 0 : index
      %13 = vector.load %arg8[%c0_11, %c0_12] : memref<8x128xf32, #tpu.memory_space<vmem>>, vector<8x128xf32>
      tpu.vector_store %arg8[%c0_11, %c0_12], %12 {strides = array<i32>} : memref<8x128xf32, #tpu.memory_space<vmem>>, vector<8x128xf32>,
    } else {
    }
    %c0 = arith.constant 0 : index
    %c0_1 = arith.constant 0 : index
    %3 = vector.load %arg8[%c0, %c0_1] : memref<8x128xf32, #tpu.memory_space<vmem>>, vector<8x128xf32>
    %c0_2 = arith.constant 0 : index
    %c0_3 = arith.constant 0 : index
    %4 = vector.load %arg3[%c0_2, %c0_3] : memref<8x128xf32, #tpu.memory_space<vmem>>, vector<8x128xf32>
    %c0_4 = arith.constant 0 : index
    %c0_5 = arith.constant 0 : index
    %5 = vector.load %arg4[%c0_4, %c0_5] : memref<128x128xf32, #tpu.memory_space<vmem>>, vector<128x128xf32>
    %cst = arith.constant dense<0.000000e+00> : vector<8x128xf32>
    %6 = tpu.matmul %4, %5, %cst {dimension_numbers = #tpu.dot_dimension_numbers<[1], [0], [0], [1], [0, 0, 1, 1], [], []>} : vector<8x128xf32>, vector<128x128xf32>, vector<8x128xf32> -> vector<8x128xf32>
    %7 = arith.addf %3, %6 : vector<8x128xf32>
    %c0_6 = arith.constant 0 : index
    %c0_7 = arith.constant 0 : index
    %8 = vector.load %arg8[%c0_6, %c0_7] : memref<8x128xf32, #tpu.memory_space<vmem>>, vector<8x128xf32>
    tpu.vector_store %arg8[%c0_6, %c0_7], %7 {strides = array<i32>} : memref<8x128xf32, #tpu.memory_space<vmem>>, vector<8x128xf32>,
    %c0_i32_8 = arith.constant 0 : i32
    %9 = arith.cmpi eq, %arg2, %c0_i32_8 : i32
    %10 = arith.extui %9 : i1 to i32
    %c0_i32_9 = arith.constant 0 : i32
    %11 = arith.cmpi ne, %10, %c0_i32_9 : i32
    scf.if %11 {
      %c0_10 = arith.constant 0 : index
      %c0_11 = arith.constant 0 : index
      %12 = vector.load %arg8[%c0_10, %c0_11] : memref<8x128xf32, #tpu.memory_space<vmem>>, vector<8x128xf32>
      %cst_12 = arith.constant 3.000000e+01 : f32
      %13 = vector.broadcast %cst_12 : f32 to vector<8x128xf32>
      %14 = arith.mulf %13, %12 : vector<8x128xf32>
      %15 = arith.negf %14 : vector<8x128xf32>
      %16 = math.exp %15 : vector<8x128xf32>
      %cst_13 = arith.constant 1.000000e+00 : f32
      %17 = vector.broadcast %cst_13 : f32 to vector<8x128xf32>
      %18 = arith.addf %17, %16 : vector<8x128xf32>
      %19 = arith.divf %17, %18 : vector<8x128xf32>
      %c0_14 = arith.constant 0 : index
      %c0_15 = arith.constant 0 : index
      %20 = vector.load %arg6[%c0_14, %c0_15] : memref<8x128xf32, #tpu.memory_space<vmem>>, vector<8x128xf32>
      tpu.vector_store %arg6[%c0_14, %c0_15], %12 {strides = array<i32>} : memref<8x128xf32, #tpu.memory_space<vmem>>, vector<8x128xf32>,
      %c0_16 = arith.constant 0 : index
      %c0_17 = arith.constant 0 : index
      %21 = vector.load %arg5[%c0_16, %c0_17] : memref<1x128xf32, #tpu.memory_space<vmem>>, vector<1x128xf32>
      %22 = vector.broadcast %21 : vector<1x128xf32> to vector<8x128xf32>
      %23 = arith.mulf %22, %19 : vector<8x128xf32>
      %c0_18 = arith.constant 0 : index
      %c0_19 = arith.constant 0 : index
      %24 = vector.load %arg7[%c0_18, %c0_19] : memref<8x128xf32, #tpu.memory_space<vmem>>, vector<8x128xf32>
      tpu.vector_store %arg7[%c0_18, %c0_19], %23 {strides = array<i32>} : memref<8x128xf32, #tpu.memory_space<vmem>>, vector<8x128xf32>,
    } else {
    }
    return
  }
  func.func @transform_0(%arg0: i32, %arg1: i32, %arg2: i32) -> (i32, i32) {
    %c0_i32 = arith.constant 0 : i32
    return %arg0, %arg2 : i32, i32
  }
  func.func @transform_1(%arg0: i32, %arg1: i32, %arg2: i32) -> (i32, i32) {
    %c0_i32 = arith.constant 0 : i32
    return %arg2, %arg1 : i32, i32
  }
  func.func @transform_2(%arg0: i32, %arg1: i32, %arg2: i32) -> (i32, i32) {
    %c0_i32 = arith.constant 0 : i32
    %c0_i32_0 = arith.constant 0 : i32
    return %c0_i32, %arg1 : i32, i32
  }
  func.func @transform_3(%arg0: i32, %arg1: i32, %arg2: i32) -> (i32, i32) {
    %c0_i32 = arith.constant 0 : i32
    return %arg0, %arg1 : i32, i32
  }
  func.func @transform_4(%arg0: i32, %arg1: i32, %arg2: i32) -> (i32, i32) {
    %c0_i32 = arith.constant 0 : i32
    return %arg0, %arg1 : i32, i32
  }
}

</mosaic_0001>

<bundles_post_ra>
// kernel: tpu_custom_call.1
= control target key start
LH: loop header
LB: loop body
LE: loop exit
PB: predicated region body
PF: predicated region fallthrough
CT: control target
= control target key end

     0   :  { %10 = vsyncpa [#allocation4], 0  ;;  %s320_s0 = inlined_call_operand.hbm [shape: f32[8,128], index: 0, kind: input, shape index: {}]   ;;  %s321_s1 = inlined_call_operand.hbm [shape: f32[128,128], index: 1, kind: input, shape index: {}]   ;;  %s322_s2 = inlined_call_operand.vmem [shape: f32[1,128], index: 2, kind: input, shape index: {}]   ;;  %s323_s3 = inlined_call_operand.hbm [shape: f32[8,128], index: 3, kind: output, shape index: {0}]   ;;  %s324_s4 = inlined_call_operand.hbm [shape: f32[8,128], index: 4, kind: output, shape index: {1}]  }
   0x1   :  { %11 = vsyncpa [#allocation7], 0 }
   0x2   :  { %12 = vsyncpa [#allocation5], 0 }
   0x3   :  { %13 = vsyncpa [#allocation10], 0  ;;  %s19_s17 = sshll.u32 %s320_s0, 4  ;;  %s274_s18 = smov [#allocation3]   ;;  %s20_s17 = int_to_ptr.hbm [resolvable:$true] %s19_s17 }
   0x4   :  { %s21_s19 = sshll.u32 %s274_s18, 4  ;;  %s29_s22 = sshll.u32 %s321_s1, 4  ;;  %s22_s19 = int_to_ptr.vmem [resolvable:$true] %s21_s19  ;;  %s30_s22 = int_to_ptr.hbm [resolvable:$true] %s29_s22 }
   0x5   :  { %24 = dma.hbm_to_vmem [thread:$0]  %s20_s17, 128, %s22_s19, [#allocation4]  }
   0x6   :  { %s275_s23 = smov [#allocation6]   ;;  %s276_s25 = smov 128  }
   0x7   :  { %s31_s24 = sshll.u32 %s275_s23, 4  ;;  %s277_s26 = smov 8   ;;  %s32_s24 = int_to_ptr.vmem [resolvable:$true] %s31_s24 }
   0x8   :  { %37 = dma.hbm_to_vmem [thread:$0]  %s30_s22, 2048, %s32_s24, [#allocation7], %s276_s25, %s276_s25, %s277_s26  }
   0x9   :  { %266 = dma.done.wait [#allocation4], 128  }
   0xa   :  { %267 = vsyncadd [#allocation4], 4294967168 }
   0xb   :  { %268 = dma.done.wait [#allocation7], 2048  }
   0xc   :  { %269 = vsyncadd [#allocation7], 4294965248  ;;  %v70_v0 = vld [vmem:[#allocation6 + $0x78] sm:$0xff]  ;;  %v69_v1 = vld [vmem:[#allocation6 + $0x70] sm:$0xff]  ;;  %s278_s0 = smov [#allocation8]   ;;  %s131_s29 = sshll.u32 %s323_s3, 4  ;;  %s132_s29 = int_to_ptr.hbm [resolvable:$true] %s131_s29 }
   0xd   :  { %71 = vmatpush.msra.mxu0 %v70_v0  ;;  %v68_v2 = vld [vmem:[#allocation6 + $0x68] sm:$0xff]  ;;  %v67_v3 = vld [vmem:[#allocation6 + $0x60] sm:$0xff]  ;;  %v66_v4 = vld [vmem:[#allocation6 + $0x58] sm:$0xff]  ;;  %s129_s1 = sshll.u32 %s278_s0, 4  ;;  %s279_s5 = smov [#allocation9]   ;;  %s130_s1 = int_to_ptr.vmem [resolvable:$true] %s129_s1 }
   0xe   :  { %v65_v5 = vld [vmem:[#allocation6 + $0x50] sm:$0xff]  ;;  %v64_v6 = vld [vmem:[#allocation6 + $0x48] sm:$0xff]  ;;  %v63_v7 = vld [vmem:[#allocation6 + $0x40] sm:$0xff]  ;;  %s140_s6 = sshll.u32 %s279_s5, 4  ;;  %s142_s9 = sshll.u32 %s324_s4, 4  ;;  %s141_s6 = int_to_ptr.vmem [resolvable:$true] %s140_s6  ;;  %s143_s9 = int_to_ptr.hbm [resolvable:$true] %s142_s9 }
   0xf   :  { %72 = vmatpush.msra.mxu0 %v69_v1  ;;  %v62_v8 = vld [vmem:[#allocation6 + $0x38] sm:$0xff]  ;;  %v61_v9 = vld [vmem:[#allocation6 + $0x30] sm:$0xff]  ;;  %v60_v10 = vld [vmem:[#allocation6 + $0x28] sm:$0xff] }
  0x10   :  { %v59_v11 = vld [vmem:[#allocation6 + $0x20] sm:$0xff]  ;;  %v58_v12 = vld [vmem:[#allocation6 + $0x18] sm:$0xff]  ;;  %v57_v13 = vld [vmem:[#allocation6 + $0x10] sm:$0xff] }
  0x11   :  { %73 = vmatpush.msra.mxu0 %v68_v2  ;;  %v56_v14 = vld [vmem:[#allocation6 + $0x8] sm:$0xff]  ;;  %v55_v15 = vld [vmem:[#allocation6] sm:$0xff]  ;;  %v54_v16 = vld [vmem:[#allocation3] sm:$0xff] }
  0x12   :  { %v165_v29 = vld [vmem:[%s322_s2] ss:$0 sm:$0xff] }
  0x13   :  { %74 = vmatpush.msra.mxu0 %v67_v3 }
  0x15   :  { %75 = vmatpush.msra.mxu0 %v66_v4 }
  0x17   :  { %76 = vmatpush.msra.mxu0 %v65_v5 }
  0x19   :  { %77 = vmatpush.msra.mxu0 %v64_v6 }
  0x1b   :  { %78 = vmatpush.msra.mxu0 %v63_v7 }
  0x1d   :  { %79 = vmatpush.msra.mxu0 %v62_v8 }
  0x1f   :  { %80 = vmatpush.msra.mxu0 %v61_v9 }
  0x21   :  { %81 = vmatpush.msra.mxu0 %v60_v10 }
  0x23   :  { %82 = vmatpush.msra.mxu0 %v59_v11 }
  0x25   :  { %83 = vmatpush.msra.mxu0 %v58_v12 }
  0x27   :  { %84 = vmatpush.msra.mxu0 %v57_v13 }
  0x29   :  { %85 = vmatpush.msra.mxu0 %v56_v14 }
  0x2b   :  { %86 = vmatpush.msra.mxu0 %v55_v15 }
  0x2c   :  { %87 = vmatmul.f32.vlgmr.msra.gmra.mxu0 %v54_v16 }
  0xa9   :  { %v88_v17 = vpop.f32.mrf.mxu0 }
  0xaa   :  { %v158_v18 = vmul.f32 -30.0, %v88_v17  ;;  %117 = vst [vmem:[#allocation8] sm:$0xff] %v88_v17 }
  0xab   :  { %134 = dma.vmem_to_hbm [thread:$0]  %s130_s1, 128, %s132_s29, [#allocation5]  }
  0xac   :  { %v99_v19 = vmul.f32 1.442695, %v158_v18 }
  0xae   :  { %166 = vpow2.f32 %v99_v19 }
  0xb4   :  { %v167_v20 = vpop.eup %166 }
  0xb5   :  { %v101_v21 = vadd.f32 1.0, %v167_v20 }
  0xb7   :  { %168 = vrcp.f32 %v101_v21  ;;  %v113_v25 = vand.u32 2147483648, %v101_v21  ;;  %v111_v27 = vand.u32 2147483647, %v101_v21  ;;  %vm107_vm1 = vweird.f32 %v101_v21 }
  0xb9   :  { %v114_v30 = vor.u32 1.1754944e-38, %v113_v25  ;;  %vm112_vm3 = vcmp.eq.f32.partialorder %v111_v27, 8.507059e+37 }
  0xbd   :  { %v169_v22 = vpop.eup %168 }
  0xbe   :  { %v103_v23 = vmul.f32 %v169_v22, %v101_v21  ;;  %vm108_vm0 = vweird.f32 %v169_v22 }
  0xbf   :  { %vm109_vm2 = vmor %vm107_vm1, %vm108_vm0 }
  0xc0   :  { %v104_v24 = vsub.f32 1.0, %v103_v23 }
  0xc2   :  { %v105_v26 = vmul.f32 %v169_v22, %v104_v24 }
  0xc4   :  { %v106_v28 = vadd.f32 %v169_v22, %v105_v26 }
  0xc6   :  { %v110_v31 = vsel %vm109_vm2, %v169_v22, %v106_v28 }
  0xc7   :  { %v115_v32 = vsel %vm112_vm3, %v114_v30, %v110_v31 }
  0xc8   :  { %v122_v33 = vmul.f32 %v165_v29, %v115_v32 }
  0xca   :  { %123 = vst [vmem:[#allocation9] sm:$0xff] %v122_v33 }
  0xcb   :  { %145 = dma.vmem_to_hbm [thread:$0]  %s141_s6, 128, %s143_s9, [#allocation10]  }
  0xcc   :  { %270 = dma.done.wait [#allocation5], 128  }
  0xcd   :  { %271 = vsyncadd [#allocation5], 4294967168 }
  0xce   :  { %272 = dma.done.wait [#allocation10], 128  }
  0xcf   :  { %273 = vsyncadd [#allocation10], 4294967168 }
  0xd0   :  { %154 = vsyncpa [#allocation4], 1 }
  0xd1   :  { %155 = vsyncpa [#allocation7], 1 }
  0xd2   :  { %156 = vsyncpa [#allocation5], 1 }
  0xd3   :  { %157 = vsyncpa [#allocation10], 1 }

</bundles_post_ra>
